<compile_context>
chip_gen: v7x
topology: tpu7x:2x2x1
jax: 0.10.0
libtpu: 0.0.40
codegen_flags: <defaults>
</compile_context>

<pallas_src>
import jax
import jax.numpy as jnp
from jax.experimental import pallas as pl
from jax.experimental.pallas import tpu as pltpu

_LANES = 128


def _mish_kernel(x_ref, o_ref):
    # Compute in f32 (v5e has no bf16 VPU/EUP; output is cast back anyway).
    # TODO(synk): bf16-native compute on v6e/v7x would halve vreg pressure.
    x = x_ref[...].astype(jnp.float32)
    # Mish(x) = x * tanh(softplus(x)).  With t = exp(-|x|) in (0, 1], the
    # tanh(softplus(x)) factor is an exact rational in t:
    #   x >= 0 : (1 + 2t) / (1 + 2t + 2t^2)
    #   x <  0 : t(t + 2) / (t(t + 2) + 2)
    t = jnp.exp(-jnp.abs(x))                       # single EUP transcendental
    two_t = t + t
    pos = x >= 0.0
    num = jnp.where(pos, 1.0 + two_t, t * (t + 2.0))
    den = num + jnp.where(pos, two_t * t, 2.0)     # reuse num (VALU trim)
    o_ref[...] = (x * (num / den)).astype(o_ref.dtype)


def _chip_params():
    """Returns (target_elems_per_block, min_grid_steps, vmem_limit_bytes)."""
    kind = ""
    try:
        kind = jax.devices()[0].device_kind.lower()
    except Exception:
        pass
    if "v7" in kind:
        # 2 TCs/chip, very fast HBM, but only 64 MiB physical VMEM:
        # 4 MiB f32 blocks, keep >=4 steps so both cores get work.
        return 1 << 20, 4, 48 * 1024 * 1024
    # v5e / v6e (single TC) or unknown backend: ~2 MiB f32 blocks are on the
    # bandwidth plateau; only ~2 steps needed for pipeline overlap.
    return 1 << 19, 2, 48 * 1024 * 1024


def _choose_block_rows(n_rows: int, target_elems: int, min_steps: int) -> int:
    """Pick a lane-dense (block_rows, 128) tile; rows are a multiple of 8."""
    sublane = 8
    target_rows = max(sublane, target_elems // _LANES)
    if n_rows <= target_rows:
        return n_rows  # single block covering the whole array (full-dim OK)
    rows_per_step = pl.cdiv(n_rows, min_steps)
    block_rows = min(target_rows, rows_per_step)
    block_rows = max(sublane, (block_rows // sublane) * sublane)
    return block_rows


def mish(x: jax.Array, *, donate_input: bool = False,
         max_block_elems: int | None = None) -> jax.Array:
    """Elementwise Mish via a Pallas TPU kernel.  Works on arbitrary shapes."""
    orig_shape = x.shape
    orig_dtype = x.dtype
    n = x.size
    if n == 0:
        return x

    target_elems, min_steps, vmem_limit = _chip_params()
    if max_block_elems is not None:
        target_elems = max(_LANES, int(max_block_elems))

    compiler_params = pltpu.CompilerParams(
        dimension_semantics=("parallel",),
        vmem_limit_bytes=vmem_limit,
    )
    io_alias = {0: 0} if donate_input else {}

    x_flat = jnp.ravel(x)
    n_rows = pl.cdiv(n, _LANES)
    block_rows = _choose_block_rows(n_rows, target_elems, min_steps)

    if n % _LANES == 0:
        # Aligned path: lane-dense (rows, 128) tiles; no pad, no slice.
        x2d = x_flat.reshape(n_rows, _LANES)
        out = pl.pallas_call(
            _mish_kernel,
            out_shape=jax.ShapeDtypeStruct((n_rows, _LANES), orig_dtype),
            grid_spec=pltpu.PrefetchScalarGridSpec(
                num_scalar_prefetch=0,
                grid=(pl.cdiv(n_rows, block_rows),),
                in_specs=[pl.BlockSpec((block_rows, _LANES), lambda i: (i, 0))],
                out_specs=pl.BlockSpec((block_rows, _LANES), lambda i: (i, 0)),
            ),
            compiler_params=compiler_params,
            input_output_aliases=io_alias,
        )(x2d)
        return out.reshape(orig_shape)

    # Ragged path: run on the flat 1-D array; the trailing partial block is
    # masked by Pallas, so there is no jnp.pad and no output slice (no extra
    # HBM passes for uneven sizes).
    if block_rows >= n_rows:
        block_elems = n                      # one block == full array
    else:
        block_elems = block_rows * _LANES    # multiple of 128; last block partial
    out = pl.pallas_call(
        _mish_kernel,
        out_shape=jax.ShapeDtypeStruct((n,), orig_dtype),
        grid_spec=pltpu.PrefetchScalarGridSpec(
            num_scalar_prefetch=0,
            grid=(pl.cdiv(n, block_elems),),
            in_specs=[pl.BlockSpec((block_elems,), lambda i: (i,))],
            out_specs=pl.BlockSpec((block_elems,), lambda i: (i,)),
        ),
        compiler_params=compiler_params,
        input_output_aliases=io_alias,
    )(x_flat)
    return out.reshape(orig_shape)


def mish_ref(x):
    # Pure-JAX reference (stable softplus + tanh formulation).
    xf = x.astype(jnp.float32)
    sp = jnp.log1p(jnp.exp(-jnp.abs(xf))) + jnp.maximum(xf, 0.0)
    return (xf * jnp.tanh(sp)).astype(x.dtype)


if __name__ == "__main__":
    key = jax.random.PRNGKey(0)

    # 1) Small NCHW input consistent with the module's typical usage (aligned).
    x = jax.random.normal(key, (2, 4, 16, 16), dtype=jnp.float32) * 3.0
    y = jax.block_until_ready(mish(x))
    assert y.shape == x.shape and y.dtype == x.dtype
    assert jnp.allclose(y, mish_ref(x), atol=1e-5, rtol=1e-5), "mismatch (aligned)"

    # 2) Ragged size (numel % 128 != 0): exercises the 1-D no-pad path.
    x2 = jax.random.normal(jax.random.PRNGKey(1), (3, 5, 7), dtype=jnp.float32) * 4.0
    y2 = jax.block_until_ready(mish(x2))
    assert jnp.allclose(y2, mish_ref(x2), atol=1e-5, rtol=1e-5), "mismatch (ragged)"

    # 3) Aligned, multi-block with a partial trailing block (masked stores).
    x3 = jax.random.normal(jax.random.PRNGKey(2), (20, 128), dtype=jnp.float32) * 3.0
    y3 = jax.block_until_ready(mish(x3, max_block_elems=1024))
    assert jnp.allclose(y3, mish_ref(x3), atol=1e-5, rtol=1e-5), "mismatch (partial 2D)"

    # 4) Ragged, multi-block with a partial trailing block on the 1-D path.
    x4 = jax.random.normal(jax.random.PRNGKey(3), (2500,), dtype=jnp.float32) * 3.0
    y4 = jax.block_until_ready(mish(x4, max_block_elems=1024))
    assert jnp.allclose(y4, mish_ref(x4), atol=1e-5, rtol=1e-5), "mismatch (partial 1D)"

    # 5) bf16 input (f32 compute inside the kernel, bf16 output).
    xb = (jax.random.normal(jax.random.PRNGKey(4), (2, 4, 16, 16)) * 3.0).astype(jnp.bfloat16)
    yb = jax.block_until_ready(mish(xb))
    assert yb.dtype == jnp.bfloat16
    assert jnp.allclose(yb.astype(jnp.float32), mish_ref(xb).astype(jnp.float32),
                        atol=2e-2, rtol=2e-2), "mismatch (bf16)"

    print("KERNEL_OK")
</pallas_src>

<mosaic_0001>
module attributes {stable_mosaic.version = 11 : i64} {
  func.func @_mish_kernel(%arg0: i32, %arg1: memref<16x128xf32, #tpu.memory_space<vmem>>, %arg2: memref<16x128xf32, #tpu.memory_space<vmem>>) attributes {dimension_semantics = [#tpu.dimension_semantics<parallel>], iteration_bounds = array<i64: 1>, scalar_prefetch = 0 : i64, scratch_operands = 0 : i64, tpu.core_type = #tpu.core_type<tc>, window_params = [{transform_indices = @transform_0, window_bounds = array<i64: 16, 128>}, {transform_indices = @transform_1, window_bounds = array<i64: 16, 128>}]} {
    %c0 = arith.constant 0 : index
    %c0_0 = arith.constant 0 : index
    %0 = vector.load %arg1[%c0, %c0_0] : memref<16x128xf32, #tpu.memory_space<vmem>>, vector<16x128xf32>
    %1 = math.absf %0 : vector<16x128xf32>
    %cst = arith.constant 0.000000e+00 : f32
    %2 = vector.broadcast %cst : f32 to vector<16x128xf32>
    %3 = arith.subf %2, %1 : vector<16x128xf32>
    %4 = math.exp %3 : vector<16x128xf32>
    %5 = arith.addf %4, %4 : vector<16x128xf32>
    %cst_1 = arith.constant 0.000000e+00 : f32
    %6 = vector.broadcast %cst_1 : f32 to vector<16x128xf32>
    %7 = arith.cmpf oge, %0, %6 : vector<16x128xf32>
    %cst_2 = arith.constant 1.000000e+00 : f32
    %8 = vector.broadcast %cst_2 : f32 to vector<16x128xf32>
    %9 = arith.addf %8, %5 : vector<16x128xf32>
    %cst_3 = arith.constant 2.000000e+00 : f32
    %10 = vector.broadcast %cst_3 : f32 to vector<16x128xf32>
    %11 = arith.addf %4, %10 : vector<16x128xf32>
    %12 = arith.mulf %4, %11 : vector<16x128xf32>
    %13 = arith.select %7, %9, %12 : vector<16x128xi1>, vector<16x128xf32>
    %14 = arith.mulf %5, %4 : vector<16x128xf32>
    %cst_4 = arith.constant 2.000000e+00 : f32
    %15 = vector.broadcast %cst_4 : f32 to vector<16x128xf32>
    %16 = arith.select %7, %14, %15 : vector<16x128xi1>, vector<16x128xf32>
    %17 = arith.addf %13, %16 : vector<16x128xf32>
    %18 = arith.divf %13, %17 : vector<16x128xf32>
    %19 = arith.mulf %0, %18 : vector<16x128xf32>
    %c0_5 = arith.constant 0 : index
    %c0_6 = arith.constant 0 : index
    %20 = vector.load %arg2[%c0_5, %c0_6] : memref<16x128xf32, #tpu.memory_space<vmem>>, vector<16x128xf32>
    tpu.vector_store %arg2[%c0_5, %c0_6], %19 {strides = array<i32>} : memref<16x128xf32, #tpu.memory_space<vmem>>, vector<16x128xf32>,
    return
  }
  func.func @transform_0(%arg0: i32) -> (i32, i32) {
    %c0_i32 = arith.constant 0 : i32
    %c0_i32_0 = arith.constant 0 : i32
    return %arg0, %c0_i32 : i32, i32
  }
  func.func @transform_1(%arg0: i32) -> (i32, i32) {
    %c0_i32 = arith.constant 0 : i32
    %c0_i32_0 = arith.constant 0 : i32
    return %arg0, %c0_i32 : i32, i32
  }
}

</mosaic_0001>

<bundles_post_ra>
// kernel: tpu_custom_call.1
= control target key start
LH: loop header
LB: loop body
LE: loop exit
PB: predicated region body
PF: predicated region fallthrough
CT: control target
= control target key end

     0   :  { %6 = vsyncpa [#allocation3], 0  ;;  %s180_s0 = inlined_call_operand.hbm [shape: f32[16,128], index: 0, kind: input, shape index: {}]   ;;  %s181_s1 = inlined_call_operand.hbm [shape: f32[16,128], index: 1, kind: output, shape index: {}]  }
   0x1   :  { %7 = vsyncpa [#allocation4], 0  ;;  %s136_s6 = smov [#allocation2]   ;;  %s88_s10 = scalar_lea.hbm %s180_s0, 256 }
   0x2   :  { %s13_s7 = sshll.u32 %s136_s6, 4  ;;  %p89_p0 = scmp.ne.s32.totalorder %s180_s0, %s88_s10  ;;  %s14_s7 = int_to_ptr.vmem [resolvable:$true] %s13_s7 }
   0x3   :  { %p92_p1 = scmp.lt.u32.totalorder %s88_s10, %s180_s0 }
   0x5   :  { %p94_p2 = pnand %p92_p1, %p89_p0 }
   0x7   :  { %97 = shalt.err (!%p94_p2)
}
   0x8   :  { %s98_s15 = scalar_lea.vmem %s14_s7, 256  ;;  %p103_p4 = scmp.lt.s32.totalorder %s14_s7, %s14_s7 }
   0x9   :  { %p99_p3 = scmp.ne.s32.totalorder %s14_s7, %s98_s15  ;;  %p104_p5 = scmp.lt.s32.totalorder %s98_s15, %s98_s15 }
   0xb   :  { %p105_p6 = por %p104_p5, %p103_p4 }
   0xd   :  { %p106_p7 = pnand %p105_p6, %p99_p3 }
   0xf   :  { %109 = shalt.err (!%p106_p7)
}
  0x10   :  { %s137_s16 = smov 128   ;;  %s138_s17 = smov 8  }
  0x11   :  { %19 = dma.hbm_to_vmem [thread:$0]  %s180_s0, 256, %s14_s7, [#allocation3], %s137_s16, %s137_s16, %s138_s17  }
  0x12   :  { %132 = dma.done.wait [#allocation3], 256  }
  0x13   :  { %133 = vsyncadd [#allocation3], 4294967040  ;;  %v23_v0 = vld [vmem:[#allocation2] sm:$0xff]  ;;  %v24_v1 = vld [vmem:[#allocation2 + $0x8] sm:$0xff]  ;;  %s139_s0 = smov [#allocation5]  }
  0x14   :  { %v25_v2 = vand.u32 2147483647, %v23_v0  ;;  %v26_v3 = vand.u32 2147483647, %v24_v1  ;;  %vm35_vm0 = vcmp.ge.f32.partialorder %v23_v0, 0.0  ;;  %vm36_vm1 = vcmp.ge.f32.partialorder %v24_v1, 0.0 }
  0x15   :  { %s64_s20 = sshll.u32 %s139_s0, 4  ;;  %s65_s20 = int_to_ptr.vmem [resolvable:$true] %s64_s20 }
  0x16   :  { %v27_v4 = vsub.f32 0.0, %v25_v2  ;;  %v28_v5 = vsub.f32 0.0, %v26_v3  ;;  %s110_s21 = scalar_lea.vmem %s65_s20, 256  ;;  %p115_p9 = scmp.lt.s32.totalorder %s65_s20, %s65_s20 }
  0x17   :  { %p111_p8 = scmp.ne.s32.totalorder %s65_s20, %s110_s21  ;;  %p116_p10 = scmp.lt.s32.totalorder %s110_s21, %s110_s21 }
  0x18   :  { %v29_v6 = vmul.f32 1.442695, %v27_v4  ;;  %v31_v7 = vmul.f32 1.442695, %v28_v5 }
  0x19   :  { %p117_p11 = por %p116_p10, %p115_p9 }
  0x1a   :  { %80 = vpow2.f32 %v29_v6 }
  0x1b   :  { %82 = vpow2.f32 %v31_v7  ;;  %p118_p12 = pnand %p117_p11, %p111_p8 }
  0x24   :  { %v81_v8 = vpop.eup %80 }
  0x25   :  { %v83_v9 = vpop.eup %82  ;;  %v33_v10 = vadd.f32 %v81_v8, %v81_v8  ;;  %v39_v11 = vadd.f32 2.0, %v81_v8 }
  0x26   :  { %v34_v12 = vadd.f32 %v83_v9, %v83_v9  ;;  %v40_v13 = vadd.f32 2.0, %v83_v9 }
  0x27   :  { %v37_v14 = vadd.f32 1.0, %v33_v10  ;;  %v41_v15 = vmul.f32 %v81_v8, %v39_v11  ;;  %v45_v16 = vmul.f32 %v81_v8, %v33_v10 }
  0x28   :  { %v38_v17 = vadd.f32 1.0, %v34_v12  ;;  %v42_v18 = vmul.f32 %v83_v9, %v40_v13  ;;  %v46_v19 = vmul.f32 %v83_v9, %v34_v12 }
  0x29   :  { %v43_v20 = vsel %vm35_vm0, %v37_v14, %v41_v15  ;;  %v47_v21 = vsel %vm35_vm0, %v45_v16, 2.0 }
  0x2a   :  { %v49_v22 = vadd.f32 %v47_v21, %v43_v20  ;;  %v44_v23 = vsel %vm36_vm1, %v38_v17, %v42_v18  ;;  %v48_v24 = vsel %vm36_vm1, %v46_v19, 2.0 }
  0x2b   :  { %v50_v25 = vadd.f32 %v48_v24, %v44_v23 }
  0x2c   :  { %84 = vrcp.f32 %v49_v22 }
  0x2d   :  { %86 = vrcp.f32 %v50_v25 }
  0x36   :  { %v85_v26 = vpop.eup %84 }
  0x37   :  { %v87_v27 = vpop.eup %86  ;;  %v52_v28 = vmul.f32 %v85_v26, %v43_v20 }
  0x38   :  { %v54_v29 = vmul.f32 %v87_v27, %v44_v23 }
  0x39   :  { %v55_v30 = vmul.f32 %v52_v28, %v23_v0 }
  0x3a   :  { %v56_v31 = vmul.f32 %v54_v29, %v24_v1 }
  0x3b   :  { %57 = vst [vmem:[#allocation5] sm:$0xff] %v55_v30 }
  0x3c   :  { %58 = vst [vmem:[#allocation5 + $0x8] sm:$0xff] %v56_v31 }
  0x3d   :  { %121 = shalt.err (!%p118_p12)
}
  0x3e   :  { %s122_s24 = scalar_lea.hbm %s181_s1, 256 }
  0x3f   :  { %p123_p13 = scmp.ne.s32.totalorder %s181_s1, %s122_s24  ;;  %p126_p0 = scmp.lt.u32.totalorder %s122_s24, %s181_s1 }
  0x41   :  { %p128_p1 = pnand %p126_p0, %p123_p13 }
  0x43   :  { %131 = shalt.err (!%p128_p1)
}
  0x44   :  { %70 = dma.vmem_to_hbm [thread:$0]  %s65_s20, 256, %s181_s1, [#allocation4], %s137_s16, %s137_s16, %s138_s17  }
  0x45   :  { %134 = dma.done.wait [#allocation4], 256  }
  0x46   :  { %135 = vsyncadd [#allocation4], 4294967040 }
  0x47   :  { %74 = vsyncpa [#allocation3], 1 }
  0x48   :  { %75 = vsyncpa [#allocation4], 1 }

</bundles_post_ra>
